<compile_context>
chip_gen: v5e
topology: v5e:2x2
jax: 0.10.0
libtpu: 0.0.40
codegen_flags: <defaults>
</compile_context>

<pallas_src>
import functools
import math

import jax
import jax.numpy as jnp
from jax import lax
from jax.experimental import pallas as pl
from jax.experimental.pallas import tpu as pltpu

_OUT_LANES = 128        # packed output slab width (one lane-dense vreg row)
_IDX_LANE_OFFSET = 64   # weights (f32 bits) in lanes [0, top_k), indices in [64, 64+top_k)


def _round_up(x, m):
    return ((x + m - 1) // m) * m


def _moe_gate_kernel(x_ref, w_ref, out_ref, *, top_k, norm_topk_prob, compute_dtype):
    # x_ref:   (BLK_T, dim)   native activation dtype; cast per-tile (no wrapper HBM pass)
    # w_ref:   (dim, E)       compute dtype (bf16), pre-transposed, constant index_map
    # out_ref: (BLK_T, 128)   int32 packed slab: f32 weight bits in lanes [0, top_k),
    #                         expert indices in lanes [64, 64+top_k)
    x = x_ref[...].astype(compute_dtype)
    w = w_ref[...]

    # logits = x @ W^T  (W already transposed to (dim, E)) -> (BLK_T, E), f32 accumulate on MXU
    logits = jnp.dot(x, w, preferred_element_type=jnp.float32)

    blk_t, n_experts = logits.shape
    expert_iota = lax.broadcasted_iota(jnp.int32, logits.shape, 1)

    # Iterative top-k directly on the raw logits (softmax is monotonic -> identical
    # indices), with first-occurrence (lowest-index) tie-breaking matching lax.top_k.
    # The -inf masking select is skipped on the last iteration.
    work = logits
    sel = []    # selected logits, (BLK_T, 1) f32, descending
    idxs = []   # selected expert indices, (BLK_T, 1) int32
    for k in range(top_k):
        mx = jnp.max(work, axis=-1, keepdims=True)
        arg = jnp.min(
            jnp.where(work == mx, expert_iota, jnp.int32(n_experts)),
            axis=-1, keepdims=True)
        sel.append(mx)
        idxs.append(arg)
        if k + 1 < top_k:
            work = jnp.where(expert_iota == arg, -jnp.inf, work)
    # TODO(synk): packed value+index key (one reduce per k) skipped: 32-bit packing
    # truncates mantissa bits and can change exact tie-breaking vs lax.top_k.

    renorm = bool(top_k > 1 and norm_topk_prob)
    m = sel[0]  # row max of logits == top-1 logit
    if renorm:
        # Renormalized weights: exp(l_k - m) / (sum_topk exp(l_j - m) + eps).
        # The full-softmax denominator cancels exactly, so only top_k exps on
        # (BLK_T, 1) slivers are needed; exp(l_top1 - m) == 1 exactly.
        exps = [jnp.ones_like(m)] + [jnp.exp(v - m) for v in sel[1:]]
        denom_k = exps[0]
        for ev in exps[1:]:
            denom_k = denom_k + ev
        # eps lands on a denominator that differs from the reference's by the
        # (canceled) full-softmax scale; effect is O(1e-20) relative (negligible).
        inv = 1.0 / (denom_k + jnp.float32(1e-20))
        vals = [ev * inv for ev in exps]
    else:
        # True softmax weights: one full-width exp+sum for the denominator, but
        # only the top_k selected values are scaled (no (BLK_T, E)-wide multiply).
        denom = jnp.sum(jnp.exp(logits - m), axis=-1, keepdims=True)
        inv = 1.0 / denom
        vals = [jnp.exp(v - m) * inv for v in sel]

    # Compose a single lane-dense int32 output slab (whole-vreg unmasked stores).
    lane = lax.broadcasted_iota(jnp.int32, (blk_t, _OUT_LANES), 1)
    out_w = jnp.zeros((blk_t, _OUT_LANES), jnp.float32)
    out_i = jnp.zeros((blk_t, _OUT_LANES), jnp.int32)
    for k in range(top_k):
        out_w = jnp.where(lane == k, vals[k], out_w)
        out_i = jnp.where(lane == _IDX_LANE_OFFSET + k, idxs[k], out_i)
    out_ref[...] = jnp.where(
        lane < _IDX_LANE_OFFSET, pltpu.bitcast(out_w, jnp.int32), out_i)


def moe_gate(hidden_states, weight, *, top_k, norm_topk_prob=True,
             blk_t=512, compute_dtype=jnp.bfloat16):
    """Pallas MoE gate. Returns (topk_idx, topk_weight, aux_loss)."""
    bsz, seq_len, h = hidden_states.shape
    n_experts, gating_dim = weight.shape
    assert gating_dim == h
    assert 1 <= top_k <= n_experts
    assert top_k <= _IDX_LANE_OFFSET
    T = bsz * seq_len

    # Token tile: large by default (amortize the ~0.35us per-grid-step overhead,
    # fill MXU rows); on v6e with moderate dim, blk_t up to 1024-2048 is fine.
    blk = max(8, (int(blk_t) // 8) * 8)
    if T > 8:
        # Guarantee >= 2 grid steps so v7x's two TensorCores both get work
        # (harmless on single-TC v5e/v6e).
        blk = min(blk, max(8, _round_up(T // 2, 8)))
    blk = min(blk, _round_up(T, 8))

    # No wrapper-side cast/pad over x: reshape is free, the ragged tail is
    # handled by the cdiv grid.  Only for very small T (< blk) a tiny row pad
    # keeps the single block inside the array extent.
    x = hidden_states.reshape(T, h)
    if blk > T:
        x = jnp.pad(x, ((0, blk - T), (0, 0)))
    T_arr = max(T, blk)
    grid_t = pl.cdiv(T_arr, blk)

    # One-time transpose/cast of the small gate weight -> (dim, E) in compute dtype.
    w_t = weight.astype(compute_dtype).T

    kernel = functools.partial(
        _moe_gate_kernel, top_k=top_k, norm_topk_prob=norm_topk_prob,
        compute_dtype=compute_dtype)

    # VMEM budget: double-buffered x tile (native dtype) + resident gate weight
    # (constant index_map -> fetched once; counted 2x to stay conservative) +
    # double-buffered packed output + f32 intermediates (logits/work/out slabs).
    x_bytes = jnp.dtype(hidden_states.dtype).itemsize
    w_bytes = jnp.dtype(compute_dtype).itemsize
    vmem_budget = (2 * blk * h * x_bytes
                   + 2 * n_experts * h * w_bytes
                   + 2 * blk * _OUT_LANES * 4
                   + 6 * blk * n_experts * 4
                   + 4 * blk * _OUT_LANES * 4)
    try:
        vmem_cap = int(pltpu.get_tpu_info().vmem_capacity_bytes)
    except Exception:
        vmem_cap = 64 << 20   # conservative fallback (v7x per-TC VMEM)
    vmem_limit = int(min(max(vmem_budget + (8 << 20), 16 << 20), (3 * vmem_cap) // 4))

    packed = pl.pallas_call(
        kernel,
        out_shape=jax.ShapeDtypeStruct((T_arr, _OUT_LANES), jnp.int32),
        grid=(grid_t,),
        in_specs=[
            pl.BlockSpec((blk, h), lambda i: (i, 0)),            # token tile (native dtype)
            pl.BlockSpec((h, n_experts), lambda i: (0, 0)),      # resident gate weight
        ],
        out_specs=pl.BlockSpec((blk, _OUT_LANES), lambda i: (i, 0)),
        compiler_params=pltpu.CompilerParams(
            dimension_semantics=("parallel",),
            vmem_limit_bytes=vmem_limit,
        ),
    )(x, w_t)

    topk_weight = lax.bitcast_convert_type(packed[:T, :top_k], jnp.float32)
    topk_idx = packed[:T, _IDX_LANE_OFFSET:_IDX_LANE_OFFSET + top_k]
    aux_loss = jnp.float32(0.0)  # inference path (module eval / alpha == 0)
    return topk_idx, topk_weight, aux_loss


def _reference(hidden_states, weight, *, top_k, norm_topk_prob=True,
               compute_dtype=jnp.bfloat16):
    """Plain-JAX reference mirroring the PyTorch forward (same bf16 matmul inputs)."""
    bsz, seq_len, h = hidden_states.shape
    x = hidden_states.reshape(-1, h).astype(compute_dtype)
    w = weight.astype(compute_dtype)
    logits = jnp.dot(x, w.T, preferred_element_type=jnp.float32)
    scores = jax.nn.softmax(logits, axis=-1)
    topk_w, topk_i = lax.top_k(scores, top_k)
    if top_k > 1 and norm_topk_prob:
        topk_w = topk_w / (jnp.sum(topk_w, axis=-1, keepdims=True) + 1e-20)
    return topk_i, topk_w


if __name__ == "__main__":
    # Small config consistent with the module:
    #   dim=32, n_routed_experts=8, num_experts_per_tok=2, norm_topk_prob=True
    bsz, seq_len, dim = 2, 8, 32
    n_routed_experts, top_k = 8, 2

    key = jax.random.PRNGKey(0)
    kx, kw = jax.random.split(key)

    hidden_states = jax.random.normal(kx, (bsz, seq_len, dim), dtype=jnp.float32)

    # kaiming_uniform_(a=sqrt(5)) on (E, dim)  ->  U(-1/sqrt(fan_in), 1/sqrt(fan_in))
    bound = 1.0 / math.sqrt(dim)
    weight = jax.random.uniform(
        kw, (n_routed_experts, dim), dtype=jnp.float32, minval=-bound, maxval=bound
    )

    topk_idx, topk_weight, aux_loss = moe_gate(
        hidden_states, weight, top_k=top_k, norm_topk_prob=True
    )
    jax.block_until_ready((topk_idx, topk_weight))

    # sanity-check against plain-JAX reference (same bf16 matmul inputs)
    ref_idx, ref_w = _reference(hidden_states, weight, top_k=top_k, norm_topk_prob=True)
    assert topk_idx.shape == (bsz * seq_len, top_k)
    assert topk_weight.shape == (bsz * seq_len, top_k)
    assert jnp.all(topk_idx == ref_idx), "top-k indices mismatch"
    assert jnp.allclose(topk_weight, ref_w, atol=2e-5), "top-k weights mismatch"

    print("KERNEL_OK")
</pallas_src>

<mosaic_0001>
module attributes {stable_mosaic.version = 11 : i64} {
  func.func @_moe_gate_kernel(%arg0: i32, %arg1: memref<8x32xf32, #tpu.memory_space<vmem>>, %arg2: memref<32x8xbf16, #tpu.memory_space<vmem>>, %arg3: memref<8x128xi32, #tpu.memory_space<vmem>>) attributes {dimension_semantics = [#tpu.dimension_semantics<parallel>], iteration_bounds = array<i64: 2>, scalar_prefetch = 0 : i64, scratch_operands = 0 : i64, tpu.core_type = #tpu.core_type<tc>, window_params = [{transform_indices = @transform_0, window_bounds = array<i64: 8, 32>}, {pipeline_mode = #tpu.pipeline_mode<synchronous>, transform_indices = @transform_1, window_bounds = array<i64: 32, 8>}, {transform_indices = @transform_2, window_bounds = array<i64: 8, 128>}]} {
    %c0 = arith.constant 0 : index
    %c0_0 = arith.constant 0 : index
    %0 = vector.load %arg1[%c0, %c0_0] : memref<8x32xf32, #tpu.memory_space<vmem>>, vector<8x32xf32>
    %1 = arith.truncf %0 : vector<8x32xf32> to vector<8x32xbf16>
    %c0_1 = arith.constant 0 : index
    %c0_2 = arith.constant 0 : index
    %2 = vector.load %arg2[%c0_1, %c0_2] : memref<32x8xbf16, #tpu.memory_space<vmem>>, vector<32x8xbf16>
    %cst = arith.constant dense<0.000000e+00> : vector<8x8xf32>
    %3 = tpu.matmul %1, %2, %cst {dimension_numbers = #tpu.dot_dimension_numbers<[1], [0], [0], [1], [0, 0, 1, 1], [], []>} : vector<8x32xbf16>, vector<32x8xbf16>, vector<8x8xf32> -> vector<8x8xf32>
    %4 = tpu.iota {dimensions = array<i32: 1>} : vector<8x8xi32>
    %cst_3 = arith.constant dense<0xFF800000> : vector<8xf32>
    %5 = vector.multi_reduction <maximumf>, %3, %cst_3 [1] : vector<8x8xf32> to vector<8xf32>
    %6 = vector.shape_cast %5 : vector<8xf32> to vector<8x1xf32>
    %7 = vector.broadcast %6 : vector<8x1xf32> to vector<8x8xf32>
    %8 = arith.cmpf oeq, %3, %7 : vector<8x8xf32>
    %c8_i32 = arith.constant 8 : i32
    %9 = vector.broadcast %c8_i32 : i32 to vector<8x8xi32>
    %10 = arith.select %8, %4, %9 : vector<8x8xi1>, vector<8x8xi32>
    %cst_4 = arith.constant dense<2147483647> : vector<8xi32>
    %11 = vector.multi_reduction <minsi>, %10, %cst_4 [1] : vector<8x8xi32> to vector<8xi32>
    %12 = vector.shape_cast %11 : vector<8xi32> to vector<8x1xi32>
    %13 = vector.broadcast %12 : vector<8x1xi32> to vector<8x8xi32>
    %14 = arith.cmpi eq, %4, %13 : vector<8x8xi32>
    %cst_5 = arith.constant 0xFF800000 : f32
    %15 = vector.broadcast %cst_5 : f32 to vector<8x8xf32>
    %16 = arith.select %14, %15, %3 : vector<8x8xi1>, vector<8x8xf32>
    %cst_6 = arith.constant dense<0xFF800000> : vector<8xf32>
    %17 = vector.multi_reduction <maximumf>, %16, %cst_6 [1] : vector<8x8xf32> to vector<8xf32>
    %18 = vector.shape_cast %17 : vector<8xf32> to vector<8x1xf32>
    %19 = vector.broadcast %18 : vector<8x1xf32> to vector<8x8xf32>
    %20 = arith.cmpf oeq, %16, %19 : vector<8x8xf32>
    %c8_i32_7 = arith.constant 8 : i32
    %21 = vector.broadcast %c8_i32_7 : i32 to vector<8x8xi32>
    %22 = arith.select %20, %4, %21 : vector<8x8xi1>, vector<8x8xi32>
    %cst_8 = arith.constant dense<2147483647> : vector<8xi32>
    %23 = vector.multi_reduction <minsi>, %22, %cst_8 [1] : vector<8x8xi32> to vector<8xi32>
    %24 = vector.shape_cast %23 : vector<8xi32> to vector<8x1xi32>
    %cst_9 = arith.constant 1.000000e+00 : f32
    %25 = vector.broadcast %cst_9 : f32 to vector<8x1xf32>
    %26 = arith.subf %18, %6 : vector<8x1xf32>
    %27 = math.exp %26 : vector<8x1xf32>
    %28 = arith.addf %25, %27 : vector<8x1xf32>
    %cst_10 = arith.constant 9.99999968E-21 : f32
    %29 = vector.broadcast %cst_10 : f32 to vector<8x1xf32>
    %30 = arith.addf %28, %29 : vector<8x1xf32>
    %cst_11 = arith.constant 1.000000e+00 : f32
    %31 = vector.broadcast %cst_11 : f32 to vector<8x1xf32>
    %32 = arith.divf %31, %30 : vector<8x1xf32>
    %33 = arith.mulf %25, %32 : vector<8x1xf32>
    %34 = arith.mulf %27, %32 : vector<8x1xf32>
    %35 = tpu.iota {dimensions = array<i32: 1>} : vector<8x128xi32>
    %cst_12 = arith.constant 0.000000e+00 : f32
    %36 = vector.broadcast %cst_12 : f32 to vector<8x128xf32>
    %c0_i32 = arith.constant 0 : i32
    %37 = vector.broadcast %c0_i32 : i32 to vector<8x128xi32>
    %c0_i32_13 = arith.constant 0 : i32
    %38 = vector.broadcast %c0_i32_13 : i32 to vector<8x128xi32>
    %39 = arith.cmpi eq, %35, %38 : vector<8x128xi32>
    %40 = vector.shape_cast %33 : vector<8x1xf32> to vector<8x1xf32>
    %41 = vector.broadcast %40 : vector<8x1xf32> to vector<8x128xf32>
    %42 = arith.select %39, %41, %36 : vector<8x128xi1>, vector<8x128xf32>
    %c64_i32 = arith.constant 64 : i32
    %43 = vector.broadcast %c64_i32 : i32 to vector<8x128xi32>
    %44 = arith.cmpi eq, %35, %43 : vector<8x128xi32>
    %45 = vector.shape_cast %12 : vector<8x1xi32> to vector<8x1xi32>
    %46 = vector.broadcast %45 : vector<8x1xi32> to vector<8x128xi32>
    %47 = arith.select %44, %46, %37 : vector<8x128xi1>, vector<8x128xi32>
    %c1_i32 = arith.constant 1 : i32
    %48 = vector.broadcast %c1_i32 : i32 to vector<8x128xi32>
    %49 = arith.cmpi eq, %35, %48 : vector<8x128xi32>
    %50 = vector.shape_cast %34 : vector<8x1xf32> to vector<8x1xf32>
    %51 = vector.broadcast %50 : vector<8x1xf32> to vector<8x128xf32>
    %52 = arith.select %49, %51, %42 : vector<8x128xi1>, vector<8x128xf32>
    %c65_i32 = arith.constant 65 : i32
    %53 = vector.broadcast %c65_i32 : i32 to vector<8x128xi32>
    %54 = arith.cmpi eq, %35, %53 : vector<8x128xi32>
    %55 = vector.shape_cast %24 : vector<8x1xi32> to vector<8x1xi32>
    %56 = vector.broadcast %55 : vector<8x1xi32> to vector<8x128xi32>
    %57 = arith.select %54, %56, %47 : vector<8x128xi1>, vector<8x128xi32>
    %c64_i32_14 = arith.constant 64 : i32
    %58 = vector.broadcast %c64_i32_14 : i32 to vector<8x128xi32>
    %59 = arith.cmpi slt, %35, %58 : vector<8x128xi32>
    %60 = tpu.bitcast %52 : vector<8x128xf32> -> vector<8x128xi32>
    %61 = arith.select %59, %60, %57 : vector<8x128xi1>, vector<8x128xi32>
    %c0_15 = arith.constant 0 : index
    %c0_16 = arith.constant 0 : index
    %62 = vector.load %arg3[%c0_15, %c0_16] : memref<8x128xi32, #tpu.memory_space<vmem>>, vector<8x128xi32>
    tpu.vector_store %arg3[%c0_15, %c0_16], %61 {strides = array<i32>} : memref<8x128xi32, #tpu.memory_space<vmem>>, vector<8x128xi32>,
    return
  }
  func.func @transform_0(%arg0: i32) -> (i32, i32) {
    %c0_i32 = arith.constant 0 : i32
    %c0_i32_0 = arith.constant 0 : i32
    return %arg0, %c0_i32 : i32, i32
  }
  func.func @transform_1(%arg0: i32) -> (i32, i32) {
    %c0_i32 = arith.constant 0 : i32
    %c0_i32_0 = arith.constant 0 : i32
    %c0_i32_1 = arith.constant 0 : i32
    return %c0_i32, %c0_i32_0 : i32, i32
  }
  func.func @transform_2(%arg0: i32) -> (i32, i32) {
    %c0_i32 = arith.constant 0 : i32
    %c0_i32_0 = arith.constant 0 : i32
    return %arg0, %c0_i32 : i32, i32
  }
}

</mosaic_0001>

<bundles_post_ra>
// kernel: tpu_custom_call.1
= control target key start
LH: loop header
LB: loop body
LE: loop exit
PB: predicated region body
PF: predicated region fallthrough
CT: control target
= control target key end

     0   :  { %7 = vsyncpa [#allocation3], 0  ;;  %s580_s0 = inlined_call_operand.vmem [shape: f32[16,32], index: 0, kind: input, shape index: {}]   ;;  %s581_s1 = inlined_call_operand.vmem [shape: bf16[32,8], index: 1, kind: input, shape index: {}]   ;;  %s582_s2 = inlined_call_operand.hbm [shape: s32[16,128], index: 2, kind: output, shape index: {}]  }
   0x1   :  { %9 = vsyncpa [#allocation3 + $0x1], 0  ;;  %s471_s9 = smov 0   ;;  %s473_s10 = smov 0  }
   0x2   :  { %s475_s11 = smov 0   ;;  %s477_s12 = smov 0  }
   0x3 LB: > { %s492_s13 = sadd.s32 4294967295, %s454_s12   ;;  %s328_s14 = sadd.s32 4294967294, %s454_s12   ;;  %s454_s12 = sphi %s477_s12, %s588_s12   ;;  %s450_s11 = sphi %s475_s11, %s587_s11   ;;  %s446_s10 = sphi %s473_s10, %s586_s10   ;;  %s442_s9 = sphi %s471_s9, %s585_s9  }
   0x4   : > { %s496_s15 = sadd.s32 1, %s454_s12   ;;  %s69_s16 = sadd.s32 1, %s450_s11 }
   0x5   : > { %s66_s17 = ssub.s32 %s454_s12, %s496_s15  ;;  %p79_p0 = scmp.ne.s32.totalorder %s450_s11, %s446_s10 }
   0x6   : > { %p67_p1 = scmp.eq.s32.totalorder %s66_s17, 0  ;;  %p80_p2 = scmp.eq.s32.totalorder %s492_s13, 1 }
   0x7   : > { %p85_p3 = scmp.ne.s32.totalorder %s446_s10, %s442_s9  ;;  %p86_p4 = scmp.eq.s32.totalorder %s328_s14, 1 }
   0x8   : > { %s507_s18 = scalar_select %p67_p1, %s450_s11, %s69_s16  }
   0x9   : > { %p509_p5 = por %p80_p2, %p79_p0  ;;  %p513_p6 = por %p86_p4, %p85_p3 }
   0xa   : > { %p331_p7 = scmp.ge.s32.totalorder %s454_s12, 1  ;;  %p114_p8 = scmp.lt.s32.totalorder %s454_s12, 3 }
   0xc   : > { %p115_p9 = pnand %p331_p7, %p114_p8 }
   0xd   : > { %p135_p10 = scmp.lt.s32.totalorder (!%p115_p9), %s492_s13, 1  ;;  %s132_s30 = sand.u32 (!%p115_p9), 1, %s446_s10  }
   0xe   : > { %118 = sbr.rel (%p115_p9) target bundleno = 884 (0x374), region = 28  ;;  %s332_s3 = sshll.u32 (!%p115_p9), %s132_s30, 3 }
   0xf   : > { %s344_s4 = sshll.u32 (!%p115_p9), %s492_s13, 3  ;;  %s134_s8 = scalar_lea.vmem (!%p115_p9), [#allocation2], %s332_s3 }
  0x10   : > { %s264_s7 = scalar_lea.hbm (!%p115_p9), %s582_s2, %s344_s4  ;;  %s254_s16 = scalar_lea.sflag (!%p115_p9), [#allocation3], %s132_s30 }
  0x11   : > { %s268_s14 = sshll.u32 (!%p115_p9), %s264_s7, 4  ;;  %s412_s24 = scalar_lea.hbm (!%p115_p9), %s582_s2, 16  ;;  %s269_s14 = int_to_ptr.hbm [resolvable:$true] %s268_s14 }
  0x12   : > { %s406_s17 = sshra.s32 (!%p115_p9), %s269_s14, 4  ;;  %s407_s17 = int_to_ptr.hbm [resolvable:$true] %s406_s17 }
  0x13   : > { %v348_v0 = vld [vmem:[%s581_s1 + $0x8] sm:$0xff]  ;;  %v347_v1 = vld [vmem:[%s581_s1] sm:$0xff]  ;;  %s136_s25 = scalar_select %p135_p10, %s492_s13, 1  ;;  %vm158_vm0 = vcmask 261120   ;;  %vm177_vm1 = vcmask 64512   ;;  %v175_v7 = vlaneseq }
  0x14   : > { %168 = vmatpush.bf16.msra.mxu0 %v348_v0  ;;  %s266_s13 = sshll.u32 %s134_s8, 4  ;;  %s408_s21 = scalar_lea.hbm %s407_s17, 8  ;;  %s267_s13 = int_to_ptr.vmem [resolvable:$true] %s266_s13 }
  0x15   : > { %s333_s26 = sshll.u32 %s136_s25, 3  ;;  %v531_v8 = vand.u32 127, %v175_v7  ;;  %p409_p11 = scmp.ne.s32.totalorder %s407_s17, %s408_s21 }
  0x16   : > { %s138_s29 = scalar_lea.vmem %s580_s0, %s333_s26  ;;  %p413_p0 = scmp.lt.s32.totalorder %s407_s17, %s582_s2 }
  0x17   : > { %v140_v2 = vld [vmem:[%s138_s29] sm:$0xff]  ;;  %vm241_vm11 = vcmp.eq.s32.totalorder %v531_v8, 0  ;;  %vm243_vm12 = vcmp.eq.s32.totalorder %v531_v8, 64  ;;  %vm247_vm13 = vcmp.eq.s32.totalorder %v531_v8, 65  ;;  %vm245_vm14 = vcmp.eq.s32.totalorder %v531_v8, 1  ;;  %p410_p12 = pnand %p409_p11, %p509_p5  ;;  %p414_p1 = scmp.lt.s32.totalorder %s412_s24, %s408_s21 }
  0x18   : > { %169 = vmatpush.bf16.msra.mxu0 %v347_v1  ;;  %v141_v3 = vpack.c.bf16 %v140_v2, %v140_v2  ;;  %vm249_vm15 = vcmp.lt.s32.totalorder %v531_v8, 64 }
  0x19   : > { %p411_p13 = pneg %p410_p12  ;;  %p415_p2 = por %p414_p1, %p413_p0 }
  0x1b   : > { %342 = vmatmul.msk.bf16.vlgmr.msra.gmra.mxu0 %vm158_vm0, %v141_v3  ;;  %p416_p3 = pnand %p415_p2, %p411_p13 }
  0x98   : > { %v171_v4 = vpop.f32.mrf.mxu0 }
  0x99   : > { %v178_v5 = vsel %vm177_vm1, %v171_v4, -inf }
  0x9a   : > { %179 = vmax.xlane.f32.xlu0 %v178_v5 }
  0xa0   : > { %v173_v6 = vpop.f32.mrf.mxu0 }
 0x10d   : > { %v180_v9 = vpop.xlane.xlu0 %179 }
 0x10e   : > { %vm181_vm2 = vcmp.eq.f32.partialorder %v171_v4, %v180_v9 }
 0x10f   : > { %v182_v10 = vsel %vm181_vm2, %v531_v8, 8 }
 0x110   : > { %v183_v11 = vsel %vm177_vm1, %v182_v10, 2147483647 }
 0x111   : > { %v185_v12 = vshra.s32 %v183_v11, 16  ;;  %v184_v14 = vand.u32 65535, %v183_v11 }
 0x113   : > { %v187_v13 = vcvt.s32.f32 %v185_v12  ;;  %v186_v16 = vcvt.s32.f32 %v184_v14 }
 0x115   : > { %188 = vmin.xlane.f32.xlu0 %v187_v13 }
 0x188   : > { %v189_v15 = vpop.xlane.xlu0 %188 }
 0x189   : > { %vm190_vm3 = vcmp.eq.f32.partialorder %v187_v13, %v189_v15  ;;  %v195_v18 = vcvt.f32.s32 %v189_v15 }
 0x18a   : > { %v191_v17 = vsel %vm190_vm3, %v186_v16, inf }
 0x18b   : > { %192 = vmin.xlane.f32.xlu1 %v191_v17  ;;  %v196_v20 = vshll.u32 %v195_v18, 16 }
 0x1fe   : > { %v193_v19 = vpop.xlane.xlu1 %192 }
 0x1ff   : > { %v194_v21 = vcvt.f32.s32 %v193_v19 }
 0x201   : > { %v197_v22 = vadd.s32 %v196_v20, %v194_v21 }
 0x203   : > { %vm198_vm4 = vcmp.eq.s32.totalorder %v531_v8, %v197_v22  ;;  %v244_v56 = vsel %vm243_vm12, %v197_v22, 0 }
 0x204   : > { %v199_v23 = vsel %vm198_vm4, -inf, %v171_v4 }
 0x205   : > { %v200_v24 = vsel %vm177_vm1, %v199_v23, -inf }
 0x206   : > { %201 = vmax.xlane.f32.xlu1 %v200_v24 }
 0x279   : > { %v202_v25 = vpop.xlane.xlu1 %201 }
 0x27a   : > { %vm203_vm5 = vcmp.eq.f32.partialorder %v199_v23, %v202_v25  ;;  %v220_v34 = vsub.f32 %v202_v25, %v180_v9 }
 0x27b   : > { %v204_v26 = vsel %vm203_vm5, %v531_v8, 8 }
 0x27c   : > { %v205_v27 = vsel %vm177_vm1, %v204_v26, 2147483647  ;;  %v221_v35 = vmul.f32 1.442695, %v220_v34 }
 0x27d   : > { %v207_v28 = vshra.s32 %v205_v27, 16  ;;  %v206_v30 = vand.u32 65535, %v205_v27 }
 0x27e   : > { %388 = vpow2.f32 %v221_v35 }
 0x27f   : > { %v209_v29 = vcvt.s32.f32 %v207_v28  ;;  %v208_v32 = vcvt.s32.f32 %v206_v30 }
 0x281   : > { %210 = vmin.xlane.f32.xlu2 %v209_v29 }
 0x284   : > { %v389_v36 = vpop.eup %388 }
 0x285   : > { %v223_v37 = vadd.f32 1.0, %v389_v36 }
 0x287   : > { %v224_v38 = vadd.f32 1e-20, %v223_v37 }
 0x289   : > { %390 = vrcp.f32 %v224_v38  ;;  %v236_v44 = vand.u32 2147483648, %v224_v38  ;;  %vm230_vm8 = vweird.f32 %v224_v38  ;;  %v234_v45 = vand.u32 2147483647, %v224_v38 }
 0x28b   : > { %v237_v47 = vor.u32 1.1754944e-38, %v236_v44  ;;  %vm235_vm10 = vcmp.eq.f32.partialorder %v234_v45, 8.507059e+37 }
 0x28f   : > { %v391_v39 = vpop.eup %390 }
 0x290   : > { %v226_v40 = vmul.f32 %v391_v39, %v224_v38  ;;  %vm231_vm7 = vweird.f32 %v391_v39 }
 0x291   : > { %vm232_vm9 = vmor %vm230_vm8, %vm231_vm7 }
 0x292   : > { %v227_v41 = vsub.f32 1.0, %v226_v40 }
 0x294   : > { %v228_v42 = vmul.f32 %v391_v39, %v227_v41 }
 0x296   : > { %v229_v43 = vadd.f32 %v391_v39, %v228_v42 }
 0x298   : > { %v233_v46 = vsel %vm232_vm9, %v391_v39, %v229_v43 }
 0x299   : > { %v238_v49 = vsel %vm235_vm10, %v237_v47, %v233_v46 }
 0x29a   : > { %v240_v51 = vmul.f32 %v389_v36, %v238_v49  ;;  %v242_v54 = vsel %vm241_vm11, %v238_v49, 0.0 }
 0x29c   : > { %v246_v58 = vsel %vm245_vm14, %v240_v51, %v242_v54 }
 0x2f4   : > { %v211_v31 = vpop.xlane.xlu2 %210 }
 0x2f5   : > { %vm212_vm6 = vcmp.eq.f32.partialorder %v209_v29, %v211_v31  ;;  %v217_v48 = vcvt.f32.s32 %v211_v31 }
 0x2f6   : > { %v213_v33 = vsel %vm212_vm6, %v208_v32, inf }
 0x2f7   : > { %214 = vmin.xlane.f32.xlu2 %v213_v33  ;;  %v218_v52 = vshll.u32 %v217_v48, 16 }
 0x36a   : > { %v215_v50 = vpop.xlane.xlu2 %214 }
 0x36b   : > { %v216_v53 = vcvt.f32.s32 %v215_v50 }
 0x36d   : > { %v219_v55 = vadd.s32 %v218_v52, %v216_v53 }
 0x36f   : > { %v248_v57 = vsel %vm247_vm13, %v219_v55, %v244_v56 }
 0x370   : > { %v251_v59 = vsel %vm249_vm15, %v246_v58, %v248_v57 }
 0x371   : > { %252 = vst [vmem:[%s134_s8] sm:$0xff] %v251_v59 }
 0x372   : > { %419 = shalt.err (!%p416_p3)
}
 0x373   : > { %349 = dma.vmem_to_hbm [thread:$0]  (%p509_p5), %s267_s13, 128, %s269_s14, %s254_s16  }
 0x374 PF: > { %p355_p4 = scmp.ge.s32.totalorder %s454_s12, 2  ;;  %s280_s27 = sand.u32 1, %s442_s9  }
 0x375   : > { %s281_s28 = scalar_lea.sflag [#allocation3], %s280_s27 }
 0x376   : > { %p352_p7 = pnand %p355_p4, %p513_p6 }
 0x378   : > { %p353_p8 = pneg %p352_p7 }
 0x37a   : > { %437 = dma.done.wait (%p353_p8), %s281_s28, 128  }
 0x37b   : > { %439 = vsyncadd (%p353_p8), %s281_s28, 4294967168  ;;  %p12_p9 = scmp.ge.s32.totalorder %s496_s15, 4   ;;  %s585_s9 = smov %s446_s10 }
 0x37c   : > { %s586_s10 = smov %s450_s11  ;;  %s587_s11 = smov %s507_s18 }
 0x37d   : > { %s588_s12 = smov %s496_s15  ;;  %14 = sbr.rel (!%p12_p9) target bundleno = 3 (0x3), region = 63 }
 0x382   :  { %287 = vsyncpa [#allocation3], 1 }
 0x383   :  { %289 = vsyncpa [#allocation3 + $0x1], 1 }

</bundles_post_ra>
